<compile_context>
chip_gen: v5e
topology: v5e:2x2
jax: 0.10.0
libtpu: 0.0.40
codegen_flags: <defaults>
</compile_context>

<pallas_src>
import jax
import jax.numpy as jnp
from jax.experimental import pallas as pl
from jax.experimental.pallas import tpu as pltpu


def _round_up(x, m):
    return ((x + m - 1) // m) * m


def _cdiv(a, b):
    return (a + b - 1) // b


def _vmem_capacity_bytes():
    """Physical VMEM per core; conservative (64 MiB, v7x) if the query fails."""
    try:
        info = pltpu.get_tpu_info()
        for attr in ("vmem_capacity_bytes", "vmem_size_bytes", "vmem_bytes"):
            v = getattr(info, attr, None)
            if v:
                return int(v)
    except Exception:
        pass
    return 64 << 20


def _mlp_kernel(x_ref, w1_ref, b1_ref, w2_ref, b2_ref, o_ref):
    # Fused: out = relu(x @ W1 + b1) @ W2 + b2
    # MXU gets bf16 operands and accumulates in fp32; bias-add / ReLU in fp32
    # on the VPU.  All feature dims are lane-dense (multiples of 128).
    x = x_ref[...].astype(jnp.bfloat16)
    h = jnp.dot(x, w1_ref[...], preferred_element_type=jnp.float32)
    h = jnp.maximum(h + b1_ref[...], 0.0)
    o = jnp.dot(h.astype(jnp.bfloat16), w2_ref[...],
                preferred_element_type=jnp.float32)
    o_ref[...] = (o + b2_ref[...]).astype(o_ref.dtype)


def base_network_forward(x_nchw, w1, b1, w2, b2, *, max_tile_m=None):
    """BaseNetwork.forward(x) == self.model(x) for the instantiated MLP model.

    x_nchw : (B, C, H, W) float32 or bfloat16
    w1     : (F, H1) float32, F = C*H*W   (fed to the MXU as bf16)
    b1     : (H1,)   float32
    w2     : (H1, O) float32              (fed to the MXU as bf16)
    b2     : (O,)    float32
    returns (B, O)   float32
    """
    B = int(x_nchw.shape[0])
    F = 1
    for d in x_nchw.shape[1:]:
        F *= int(d)
    H1 = int(w1.shape[1])
    O = int(w2.shape[1])

    x_item = jnp.dtype(x_nchw.dtype).itemsize

    # ---- lane-dense padded feature dims -------------------------------------
    F_pad = _round_up(F, 128)
    H1_pad = _round_up(H1, 128)
    O_pad = _round_up(O, 128)

    # ---- per-chip VMEM budget ------------------------------------------------
    vmem_cap = _vmem_capacity_bytes()
    budget = min(int(vmem_cap * 0.75), 100 << 20)       # headroom below physical
    if max_tile_m is None:
        max_tile_m = 512 if vmem_cap >= (96 << 20) else 256

    # VMEM footprint pieces (lane/sublane padded, buffer-aware):
    #   weights/biases resident single-buffered; x/out tiles double-buffered.
    weight_bytes = (F_pad * H1_pad * 2 + H1_pad * O_pad * 2   # bf16 W1, W2
                    + 8 * H1_pad * 4 + 8 * O_pad * 4)         # f32 biases (8-sublane pad)
    per_row_bytes = 2 * (F_pad * x_item + O_pad * 4)          # 2x-buffered x + out rows

    # ---- batch tiling ----------------------------------------------------------
    B_pad8 = _round_up(B, 8)
    # v7x has two TensorCores: make grid_m >= 2 whenever the batch allows so the
    # "parallel" batch axis can shard (harmless on single-TC v5e/v6e).
    half = _round_up(_cdiv(B_pad8, 2), 8) if B_pad8 >= 16 else B_pad8
    tile_m = min(max_tile_m, half)
    # Fit double-buffered tiles + resident weights inside the VMEM budget.
    rows_fit = (budget - weight_bytes) // per_row_bytes
    rows_fit = max((rows_fit // 8) * 8, 8)
    tile_m = min(tile_m, rows_fit)
    if tile_m >= 128:
        tile_m = (tile_m // 128) * 128                   # full MXU row passes
    tile_m = max(tile_m, 8)
    B_pad = _round_up(B_pad8, tile_m)
    grid_m = B_pad // tile_m

    # ---- glue (reshape is a view; pads are small one-off copies) ---------------
    x2d = x_nchw.reshape(B, F)                           # nn.Flatten, no dtype cast
    if (B_pad - B) or (F_pad - F):
        x2d = jnp.pad(x2d, ((0, B_pad - B), (0, F_pad - F)))

    # bf16 params -> half the weight DMA traffic; zero-padding keeps numerics
    # identical (zero W1 cols -> ReLU(0)=0 -> zero W2 rows; zero b2 pad cols).
    w1_b = jnp.pad(w1, ((0, F_pad - F), (0, H1_pad - H1))).astype(jnp.bfloat16)
    w2_b = jnp.pad(w2, ((0, H1_pad - H1), (0, O_pad - O))).astype(jnp.bfloat16)
    b1_2d = jnp.pad(b1, (0, H1_pad - H1)).reshape(1, H1_pad).astype(jnp.float32)
    b2_2d = jnp.pad(b2, (0, O_pad - O)).reshape(1, O_pad).astype(jnp.float32)

    # ---- VMEM limit & cost hint -------------------------------------------------
    tile_bytes = tile_m * per_row_bytes
    vmem_est = weight_bytes + tile_bytes
    vmem_limit = int(min(max(int(vmem_est * 1.25), 32 << 20), budget))

    cost = pl.CostEstimate(
        flops=2 * B_pad * F_pad * H1_pad + 2 * B_pad * H1_pad * O_pad,
        transcendentals=0,
        bytes_accessed=(B_pad * F_pad * x_item
                        + F_pad * H1_pad * 2 + H1_pad * O_pad * 2
                        + (H1_pad + O_pad) * 4
                        + B_pad * O_pad * 4),
    )

    def _call(single_buffer_weights):
        if single_buffer_weights:
            def const_spec(shape):
                # Constant index_map -> one resident copy is enough.
                return pl.BlockSpec(shape, lambda i: (0, 0),
                                    pipeline_mode=pl.Buffered(1))
        else:
            def const_spec(shape):
                return pl.BlockSpec(shape, lambda i: (0, 0))

        out = pl.pallas_call(
            _mlp_kernel,
            out_shape=jax.ShapeDtypeStruct((B_pad, O_pad), jnp.float32),
            grid=(grid_m,),
            in_specs=[
                pl.BlockSpec((tile_m, F_pad), lambda i: (i, 0)),  # x: batch-tiled, pipelined
                const_spec((F_pad, H1_pad)),                      # W1: VMEM-resident
                const_spec((1, H1_pad)),                          # b1
                const_spec((H1_pad, O_pad)),                      # W2: VMEM-resident
                const_spec((1, O_pad)),                           # b2
            ],
            out_specs=pl.BlockSpec((tile_m, O_pad), lambda i: (i, 0)),
            compiler_params=pltpu.CompilerParams(
                dimension_semantics=("parallel",),                # shards across v7x's 2 TCs
                vmem_limit_bytes=vmem_limit,
            ),
            cost_estimate=cost,
        )(x2d, w1_b, b1_2d, w2_b, b2_2d)
        return jax.block_until_ready(out)

    try:
        out = _call(True)
    except Exception:
        # pipeline_mode=pl.Buffered(1) not supported on this build: fall back to
        # default double-buffered weight specs (correctness unchanged).
        out = _call(False)

    # Slice away the batch / lane padding.
    return out[:B, :O]


def _reference_forward(x_nchw, w1, b1, w2, b2):
    # Same numerics as the kernel: bf16 matmul operands, fp32 accumulation.
    B = x_nchw.shape[0]
    x2d = x_nchw.reshape(B, -1).astype(jnp.bfloat16)
    h = jnp.dot(x2d, w1.astype(jnp.bfloat16), preferred_element_type=jnp.float32)
    h = jnp.maximum(h + b1[None, :].astype(jnp.float32), 0.0)
    o = jnp.dot(h.astype(jnp.bfloat16), w2.astype(jnp.bfloat16),
                preferred_element_type=jnp.float32)
    return o + b2[None, :].astype(jnp.float32)


if __name__ == "__main__":
    # Small shapes consistent with BaseNetwork(input_shape, output_shape):
    #   input_shape  = (4, 16, 16)  -> F = 1024
    #   output_shape = (16,)        -> O = 16
    #   hidden       = 32
    B, C, H, W = 2, 4, 16, 16
    F = C * H * W
    HIDDEN = 32
    OUT = 16

    key = jax.random.PRNGKey(0)
    kx, k1, k2, k3, k4 = jax.random.split(key, 5)

    x = jax.random.normal(kx, (B, C, H, W), dtype=jnp.float32)
    w1 = jax.random.normal(k1, (F, HIDDEN), dtype=jnp.float32) * 0.05
    b1 = jax.random.normal(k2, (HIDDEN,), dtype=jnp.float32) * 0.05
    w2 = jax.random.normal(k3, (HIDDEN, OUT), dtype=jnp.float32) * 0.05
    b2 = jax.random.normal(k4, (OUT,), dtype=jnp.float32) * 0.05

    out = jax.block_until_ready(base_network_forward(x, w1, b1, w2, b2))
    ref = _reference_forward(x, w1, b1, w2, b2)

    assert out.shape == (B, OUT), out.shape
    assert jnp.allclose(out, ref, atol=1e-2, rtol=1e-2), "mismatch vs reference"

    print("KERNEL_OK")
</pallas_src>

<mosaic_0001>
module attributes {stable_mosaic.version = 11 : i64} {
  func.func @_mlp_kernel(%arg0: i32, %arg1: memref<8x1024xf32, #tpu.memory_space<vmem>>, %arg2: memref<1024x128xbf16, #tpu.memory_space<vmem>>, %arg3: memref<1x128xf32, #tpu.memory_space<vmem>>, %arg4: memref<128x128xbf16, #tpu.memory_space<vmem>>, %arg5: memref<1x128xf32, #tpu.memory_space<vmem>>, %arg6: memref<8x128xf32, #tpu.memory_space<vmem>>) attributes {dimension_semantics = [#tpu.dimension_semantics<parallel>], iteration_bounds = array<i64: 1>, scalar_prefetch = 0 : i64, scratch_operands = 0 : i64, tpu.core_type = #tpu.core_type<tc>, window_params = [{transform_indices = @transform_0, window_bounds = array<i64: 8, 1024>}, {pipeline_mode = #tpu.pipeline_mode<synchronous>, transform_indices = @transform_1, window_bounds = array<i64: 1024, 128>}, {pipeline_mode = #tpu.pipeline_mode<synchronous>, transform_indices = @transform_2, window_bounds = array<i64: 1, 128>}, {pipeline_mode = #tpu.pipeline_mode<synchronous>, transform_indices = @transform_3, window_bounds = array<i64: 128, 128>}, {pipeline_mode = #tpu.pipeline_mode<synchronous>, transform_indices = @transform_4, window_bounds = array<i64: 1, 128>}, {transform_indices = @transform_5, window_bounds = array<i64: 8, 128>}]} {
    %c0 = arith.constant 0 : index
    %c0_0 = arith.constant 0 : index
    %0 = vector.load %arg1[%c0, %c0_0] : memref<8x1024xf32, #tpu.memory_space<vmem>>, vector<8x1024xf32>
    %1 = arith.truncf %0 : vector<8x1024xf32> to vector<8x1024xbf16>
    %c0_1 = arith.constant 0 : index
    %c0_2 = arith.constant 0 : index
    %2 = vector.load %arg2[%c0_1, %c0_2] : memref<1024x128xbf16, #tpu.memory_space<vmem>>, vector<1024x128xbf16>
    %cst = arith.constant dense<0.000000e+00> : vector<8x128xf32>
    %3 = tpu.matmul %1, %2, %cst {dimension_numbers = #tpu.dot_dimension_numbers<[1], [0], [0], [1], [0, 0, 1, 1], [], []>} : vector<8x1024xbf16>, vector<1024x128xbf16>, vector<8x128xf32> -> vector<8x128xf32>
    %c0_3 = arith.constant 0 : index
    %c0_4 = arith.constant 0 : index
    %4 = vector.load %arg3[%c0_3, %c0_4] : memref<1x128xf32, #tpu.memory_space<vmem>>, vector<1x128xf32>
    %5 = vector.broadcast %4 : vector<1x128xf32> to vector<8x128xf32>
    %6 = arith.addf %3, %5 : vector<8x128xf32>
    %cst_5 = arith.constant 0.000000e+00 : f32
    %7 = vector.broadcast %cst_5 : f32 to vector<8x128xf32>
    %8 = arith.maximumf %6, %7 : vector<8x128xf32>
    %9 = arith.truncf %8 : vector<8x128xf32> to vector<8x128xbf16>
    %c0_6 = arith.constant 0 : index
    %c0_7 = arith.constant 0 : index
    %10 = vector.load %arg4[%c0_6, %c0_7] : memref<128x128xbf16, #tpu.memory_space<vmem>>, vector<128x128xbf16>
    %cst_8 = arith.constant dense<0.000000e+00> : vector<8x128xf32>
    %11 = tpu.matmul %9, %10, %cst_8 {dimension_numbers = #tpu.dot_dimension_numbers<[1], [0], [0], [1], [0, 0, 1, 1], [], []>} : vector<8x128xbf16>, vector<128x128xbf16>, vector<8x128xf32> -> vector<8x128xf32>
    %c0_9 = arith.constant 0 : index
    %c0_10 = arith.constant 0 : index
    %12 = vector.load %arg5[%c0_9, %c0_10] : memref<1x128xf32, #tpu.memory_space<vmem>>, vector<1x128xf32>
    %13 = vector.broadcast %12 : vector<1x128xf32> to vector<8x128xf32>
    %14 = arith.addf %11, %13 : vector<8x128xf32>
    %c0_11 = arith.constant 0 : index
    %c0_12 = arith.constant 0 : index
    %15 = vector.load %arg6[%c0_11, %c0_12] : memref<8x128xf32, #tpu.memory_space<vmem>>, vector<8x128xf32>
    tpu.vector_store %arg6[%c0_11, %c0_12], %14 {strides = array<i32>} : memref<8x128xf32, #tpu.memory_space<vmem>>, vector<8x128xf32>,
    return
  }
  func.func @transform_0(%arg0: i32) -> (i32, i32) {
    %c0_i32 = arith.constant 0 : i32
    %c0_i32_0 = arith.constant 0 : i32
    return %arg0, %c0_i32 : i32, i32
  }
  func.func @transform_1(%arg0: i32) -> (i32, i32) {
    %c0_i32 = arith.constant 0 : i32
    %c0_i32_0 = arith.constant 0 : i32
    %c0_i32_1 = arith.constant 0 : i32
    return %c0_i32, %c0_i32_0 : i32, i32
  }
  func.func @transform_2(%arg0: i32) -> (i32, i32) {
    %c0_i32 = arith.constant 0 : i32
    %c0_i32_0 = arith.constant 0 : i32
    %c0_i32_1 = arith.constant 0 : i32
    return %c0_i32, %c0_i32_0 : i32, i32
  }
  func.func @transform_3(%arg0: i32) -> (i32, i32) {
    %c0_i32 = arith.constant 0 : i32
    %c0_i32_0 = arith.constant 0 : i32
    %c0_i32_1 = arith.constant 0 : i32
    return %c0_i32, %c0_i32_0 : i32, i32
  }
  func.func @transform_4(%arg0: i32) -> (i32, i32) {
    %c0_i32 = arith.constant 0 : i32
    %c0_i32_0 = arith.constant 0 : i32
    %c0_i32_1 = arith.constant 0 : i32
    return %c0_i32, %c0_i32_0 : i32, i32
  }
  func.func @transform_5(%arg0: i32) -> (i32, i32) {
    %c0_i32 = arith.constant 0 : i32
    %c0_i32_0 = arith.constant 0 : i32
    return %arg0, %c0_i32 : i32, i32
  }
}

module attributes {stable_mosaic.version = 11 : i64} {
  func.func @_mlp_kernel(%arg0: i32, %arg1: memref<8x1024xf32, #tpu.memory_space<vmem>>, %arg2: memref<1024x128xbf16, #tpu.memory_space<vmem>>, %arg3: memref<1x128xf32, #tpu.memory_space<vmem>>, %arg4: memref<128x128xbf16, #tpu.memory_space<vmem>>, %arg5: memref<1x128xf32, #tpu.memory_space<vmem>>, %arg6: memref<8x128xf32, #tpu.memory_space<vmem>>) attributes {dimension_semantics = [#tpu.dimension_semantics<parallel>], iteration_bounds = array<i64: 1>, scalar_prefetch = 0 : i64, scratch_operands = 0 : i64, tpu.core_type = #tpu.core_type<tc>, window_params = [{transform_indices = @transform_0, window_bounds = array<i64: 8, 1024>}, {pipeline_mode = #tpu.pipeline_mode<synchronous>, transform_indices = @transform_1, window_bounds = array<i64: 1024, 128>}, {pipeline_mode = #tpu.pipeline_mode<synchronous>, transform_indices = @transform_2, window_bounds = array<i64: 1, 128>}, {pipeline_mode = #tpu.pipeline_mode<synchronous>, transform_indices = @transform_3, window_bounds = array<i64: 128, 128>}, {pipeline_mode = #tpu.pipeline_mode<synchronous>, transform_indices = @transform_4, window_bounds = array<i64: 1, 128>}, {transform_indices = @transform_5, window_bounds = array<i64: 8, 128>}]} {
    %c0 = arith.constant 0 : index
    %c0_0 = arith.constant 0 : index
    %0 = vector.load %arg1[%c0, %c0_0] : memref<8x1024xf32, #tpu.memory_space<vmem>>, vector<8x1024xf32>
    %1 = arith.truncf %0 : vector<8x1024xf32> to vector<8x1024xbf16>
    %c0_1 = arith.constant 0 : index
    %c0_2 = arith.constant 0 : index
    %2 = vector.load %arg2[%c0_1, %c0_2] : memref<1024x128xbf16, #tpu.memory_space<vmem>>, vector<1024x128xbf16>
    %cst = arith.constant dense<0.000000e+00> : vector<8x128xf32>
    %3 = tpu.matmul %1, %2, %cst {dimension_numbers = #tpu.dot_dimension_numbers<[1], [0], [0], [1], [0, 0, 1, 1], [], []>} : vector<8x1024xbf16>, vector<1024x128xbf16>, vector<8x128xf32> -> vector<8x128xf32>
    %c0_3 = arith.constant 0 : index
    %c0_4 = arith.constant 0 : index
    %4 = vector.load %arg3[%c0_3, %c0_4] : memref<1x128xf32, #tpu.memory_space<vmem>>, vector<1x128xf32>
    %5 = vector.broadcast %4 : vector<1x128xf32> to vector<8x128xf32>
    %6 = arith.addf %3, %5 : vector<8x128xf32>
    %cst_5 = arith.constant 0.000000e+00 : f32
    %7 = vector.broadcast %cst_5 : f32 to vector<8x128xf32>
    %8 = arith.maximumf %6, %7 : vector<8x128xf32>
    %9 = arith.truncf %8 : vector<8x128xf32> to vector<8x128xbf16>
    %c0_6 = arith.constant 0 : index
    %c0_7 = arith.constant 0 : index
    %10 = vector.load %arg4[%c0_6, %c0_7] : memref<128x128xbf16, #tpu.memory_space<vmem>>, vector<128x128xbf16>
    %cst_8 = arith.constant dense<0.000000e+00> : vector<8x128xf32>
    %11 = tpu.matmul %9, %10, %cst_8 {dimension_numbers = #tpu.dot_dimension_numbers<[1], [0], [0], [1], [0, 0, 1, 1], [], []>} : vector<8x128xbf16>, vector<128x128xbf16>, vector<8x128xf32> -> vector<8x128xf32>
    %c0_9 = arith.constant 0 : index
    %c0_10 = arith.constant 0 : index
    %12 = vector.load %arg5[%c0_9, %c0_10] : memref<1x128xf32, #tpu.memory_space<vmem>>, vector<1x128xf32>
    %13 = vector.broadcast %12 : vector<1x128xf32> to vector<8x128xf32>
    %14 = arith.addf %11, %13 : vector<8x128xf32>
    %c0_11 = arith.constant 0 : index
    %c0_12 = arith.constant 0 : index
    %15 = vector.load %arg6[%c0_11, %c0_12] : memref<8x128xf32, #tpu.memory_space<vmem>>, vector<8x128xf32>
    tpu.vector_store %arg6[%c0_11, %c0_12], %14 {strides = array<i32>} : memref<8x128xf32, #tpu.memory_space<vmem>>, vector<8x128xf32>,
    return
  }
  func.func @transform_0(%arg0: i32) -> (i32, i32) {
    %c0_i32 = arith.constant 0 : i32
    %c0_i32_0 = arith.constant 0 : i32
    return %arg0, %c0_i32 : i32, i32
  }
  func.func @transform_1(%arg0: i32) -> (i32, i32) {
    %c0_i32 = arith.constant 0 : i32
    %c0_i32_0 = arith.constant 0 : i32
    %c0_i32_1 = arith.constant 0 : i32
    return %c0_i32, %c0_i32_0 : i32, i32
  }
  func.func @transform_2(%arg0: i32) -> (i32, i32) {
    %c0_i32 = arith.constant 0 : i32
    %c0_i32_0 = arith.constant 0 : i32
    %c0_i32_1 = arith.constant 0 : i32
    return %c0_i32, %c0_i32_0 : i32, i32
  }
  func.func @transform_3(%arg0: i32) -> (i32, i32) {
    %c0_i32 = arith.constant 0 : i32
    %c0_i32_0 = arith.constant 0 : i32
    %c0_i32_1 = arith.constant 0 : i32
    return %c0_i32, %c0_i32_0 : i32, i32
  }
  func.func @transform_4(%arg0: i32) -> (i32, i32) {
    %c0_i32 = arith.constant 0 : i32
    %c0_i32_0 = arith.constant 0 : i32
    %c0_i32_1 = arith.constant 0 : i32
    return %c0_i32, %c0_i32_0 : i32, i32
  }
  func.func @transform_5(%arg0: i32) -> (i32, i32) {
    %c0_i32 = arith.constant 0 : i32
    %c0_i32_0 = arith.constant 0 : i32
    return %arg0, %c0_i32 : i32, i32
  }
}

</mosaic_0001>

<bundles_post_ra>
// kernel: tpu_custom_call.1
= control target key start
LH: loop header
LB: loop body
LE: loop exit
PB: predicated region body
PF: predicated region fallthrough
CT: control target
= control target key end

     0   :  { %10 = vsyncpa [#allocation3], 0  ;;  %s1328_s0 = inlined_call_operand.hbm [shape: f32[8,1024], index: 0, kind: input, shape index: {}]   ;;  %s1329_s1 = inlined_call_operand.hbm [shape: bf16[1024,128], index: 1, kind: input, shape index: {}]   ;;  %s1330_s2 = inlined_call_operand.vmem [shape: f32[1,128], index: 2, kind: input, shape index: {}]   ;;  %s1331_s3 = inlined_call_operand.hbm [shape: bf16[128,128], index: 3, kind: input, shape index: {}]   ;;  %s1332_s4 = inlined_call_operand.vmem [shape: f32[1,128], index: 4, kind: input, shape index: {}]   ;;  %s1333_s5 = inlined_call_operand.hbm [shape: f32[8,128], index: 5, kind: output, shape index: {}]  }
   0x1   :  { %11 = vsyncpa [#allocation6], 0  ;;  %s28_s20 = sshll.u32 %s1329_s1, 4  ;;  %s29_s20 = int_to_ptr.hbm [resolvable:$true] %s28_s20 }
   0x2   :  { %12 = vsyncpa [#allocation4], 0  ;;  %s1274_s21 = smov [#allocation5]   ;;  %s18_s25 = sshll.u32 %s1328_s0, 4  ;;  %s19_s25 = int_to_ptr.hbm [resolvable:$true] %s18_s25 }
   0x3   :  { %s30_s22 = sshll.u32 %s1274_s21, 4  ;;  %s1275_s26 = smov 64   ;;  %s31_s22 = int_to_ptr.vmem [resolvable:$true] %s30_s22 }
   0x4   :  { %s1276_s27 = smov 4   ;;  %s1277_s28 = smov [#allocation2]  }
   0x5   :  { %36 = dma.hbm_to_vmem [thread:$0]  %s29_s20, 8192, %s31_s22, [#allocation6], %s1275_s26, %s1275_s26, %s1276_s27  }
   0x6   :  { %s20_s29 = sshll.u32 %s1277_s28, 4  ;;  %s43_s7 = sshll.u32 %s1331_s3, 4  ;;  %s21_s29 = int_to_ptr.vmem [resolvable:$true] %s20_s29  ;;  %s44_s7 = int_to_ptr.hbm [resolvable:$true] %s43_s7 }
   0x7   :  { %23 = dma.hbm_to_vmem [thread:$0]  %s19_s25, 1024, %s21_s29, [#allocation3]  }
   0x8   :  { %s1278_s1 = smov [#allocation7]  }
   0x9   :  { %s45_s8 = sshll.u32 %s1278_s1, 4  ;;  %s46_s8 = int_to_ptr.vmem [resolvable:$true] %s45_s8 }
   0xa   :  { %51 = dma.hbm_to_vmem [thread:$0]  %s44_s7, 1024, %s46_s8, [#allocation6], %s1275_s26, %s1275_s26, %s1276_s27  }
   0xb   :  { %1268 = dma.done.wait [#allocation3], 1024  }
   0xc   :  { %1269 = vsyncadd [#allocation3], 4294966272 }
   0xd   :  { %1270 = dma.done.wait [#allocation6], 9216  }
   0xe   :  { %1271 = vsyncadd [#allocation6], 4294958080  ;;  %v1099_v0 = vld [vmem:[#allocation5 + $0x38] sm:$0xff]  ;;  %v1098_v4 = vld [vmem:[#allocation5 + $0x30] sm:$0xff]  ;;  %s1279_s10 = smov [#allocation8]   ;;  %s793_s14 = sshll.u32 %s1333_s5, 4  ;;  %s794_s14 = int_to_ptr.hbm [resolvable:$true] %s793_s14 }
   0xf   :  { %v1107_v1 = vld [vmem:[#allocation5 + $0x78] sm:$0xff]  ;;  %598 = vmatpush.bf16.msra.mxu0 %v1099_v0  ;;  %v1106_v5 = vld [vmem:[#allocation5 + $0x70] sm:$0xff]  ;;  %v1097_v8 = vld [vmem:[#allocation5 + $0x28] sm:$0xff]  ;;  %s791_s11 = sshll.u32 %s1279_s10, 4  ;;  %s792_s11 = int_to_ptr.vmem [resolvable:$true] %s791_s11 }
  0x10   :  { %v1115_v2 = vld [vmem:[#allocation5 + $0xb8] sm:$0xff]  ;;  %611 = vmatpush.bf16.msra.mxu1 %v1107_v1  ;;  %v1114_v6 = vld [vmem:[#allocation5 + $0xb0] sm:$0xff]  ;;  %v1105_v9 = vld [vmem:[#allocation5 + $0x68] sm:$0xff] }
  0x11   :  { %v1123_v3 = vld [vmem:[#allocation5 + $0xf8] sm:$0xff]  ;;  %624 = vmatpush.bf16.msra.mxu2 %v1115_v2  ;;  %v1122_v7 = vld [vmem:[#allocation5 + $0xf0] sm:$0xff]  ;;  %v1113_v10 = vld [vmem:[#allocation5 + $0xa8] sm:$0xff] }
  0x12   :  { %637 = vmatpush.bf16.msra.mxu3 %v1123_v3  ;;  %v1121_v11 = vld [vmem:[#allocation5 + $0xe8] sm:$0xff]  ;;  %v1096_v12 = vld [vmem:[#allocation5 + $0x20] sm:$0xff]  ;;  %v1095_v16 = vld [vmem:[#allocation5 + $0x18] sm:$0xff] }
  0x13   :  { %599 = vmatpush.bf16.msra.mxu0 %v1098_v4  ;;  %v1104_v13 = vld [vmem:[#allocation5 + $0x60] sm:$0xff]  ;;  %v1103_v17 = vld [vmem:[#allocation5 + $0x58] sm:$0xff]  ;;  %v1094_v20 = vld [vmem:[#allocation5 + $0x10] sm:$0xff] }
  0x14   :  { %612 = vmatpush.bf16.msra.mxu1 %v1106_v5  ;;  %v1112_v14 = vld [vmem:[#allocation5 + $0xa0] sm:$0xff]  ;;  %v1111_v18 = vld [vmem:[#allocation5 + $0x98] sm:$0xff]  ;;  %v1102_v21 = vld [vmem:[#allocation5 + $0x50] sm:$0xff] }
  0x15   :  { %625 = vmatpush.bf16.msra.mxu2 %v1114_v6  ;;  %v1120_v15 = vld [vmem:[#allocation5 + $0xe0] sm:$0xff]  ;;  %v1119_v19 = vld [vmem:[#allocation5 + $0xd8] sm:$0xff]  ;;  %v1110_v22 = vld [vmem:[#allocation5 + $0x90] sm:$0xff] }
  0x16   :  { %638 = vmatpush.bf16.msra.mxu3 %v1122_v7  ;;  %v1118_v23 = vld [vmem:[#allocation5 + $0xd0] sm:$0xff]  ;;  %v1093_v24 = vld [vmem:[#allocation5 + $0x8] sm:$0xff]  ;;  %v1092_v28 = vld [vmem:[#allocation5] sm:$0xff] }
  0x17   :  { %600 = vmatpush.bf16.msra.mxu0 %v1097_v8  ;;  %v1101_v25 = vld [vmem:[#allocation5 + $0x48] sm:$0xff]  ;;  %v1100_v29 = vld [vmem:[#allocation5 + $0x40] sm:$0xff]  ;;  %v1131_v32 = vld [vmem:[#allocation5 + $0x138] sm:$0xff] }
  0x18   :  { %613 = vmatpush.bf16.msra.mxu1 %v1105_v9  ;;  %v1109_v26 = vld [vmem:[#allocation5 + $0x88] sm:$0xff]  ;;  %v1108_v30 = vld [vmem:[#allocation5 + $0x80] sm:$0xff]  ;;  %v68_v33 = vld [vmem:[#allocation2 + $0x10] sm:$0xff] }
  0x19   :  { %626 = vmatpush.bf16.msra.mxu2 %v1113_v10  ;;  %v1117_v27 = vld [vmem:[#allocation5 + $0xc8] sm:$0xff]  ;;  %v1116_v31 = vld [vmem:[#allocation5 + $0xc0] sm:$0xff]  ;;  %v1139_v35 = vld [vmem:[#allocation5 + $0x178] sm:$0xff]  ;;  %v76_v40 = vpack.c.bf16 %v68_v33, %v68_v33 }
  0x1a   :  { %639 = vmatpush.bf16.msra.mxu3 %v1121_v11  ;;  %v66_v34 = vld [vmem:[#allocation2] sm:$0xff]  ;;  %v69_v36 = vld [vmem:[#allocation2 + $0x18] sm:$0xff]  ;;  %v67_v37 = vld [vmem:[#allocation2 + $0x8] sm:$0xff] }
  0x1b   :  { %601 = vmatpush.bf16.msra.mxu0 %v1096_v12  ;;  %v1147_v38 = vld [vmem:[#allocation5 + $0x1b8] sm:$0xff]  ;;  %v74_v41 = vpack.c.bf16 %v66_v34, %v66_v34  ;;  %v77_v42 = vpack.c.bf16 %v69_v36, %v69_v36  ;;  %v75_v43 = vpack.c.bf16 %v67_v37, %v67_v37  ;;  %v1130_v44 = vld [vmem:[#allocation5 + $0x130] sm:$0xff]  ;;  %v1129_v48 = vld [vmem:[#allocation5 + $0x128] sm:$0xff] }
  0x1c   :  { %614 = vmatpush.bf16.msra.mxu1 %v1104_v13  ;;  %v1155_v39 = vld [vmem:[#allocation5 + $0x1f8] sm:$0xff]  ;;  %v1138_v45 = vld [vmem:[#allocation5 + $0x170] sm:$0xff]  ;;  %v1137_v49 = vld [vmem:[#allocation5 + $0x168] sm:$0xff] }
  0x1d   :  { %627 = vmatpush.bf16.msra.mxu2 %v1112_v14  ;;  %v1146_v46 = vld [vmem:[#allocation5 + $0x1b0] sm:$0xff]  ;;  %v1145_v50 = vld [vmem:[#allocation5 + $0x1a8] sm:$0xff]  ;;  %v1128_v52 = vld [vmem:[#allocation5 + $0x120] sm:$0xff] }
  0x1e   :  { %640 = vmatpush.bf16.msra.mxu3 %v1120_v15  ;;  %v1154_v47 = vld [vmem:[#allocation5 + $0x1f0] sm:$0xff]  ;;  %v1153_v51 = vld [vmem:[#allocation5 + $0x1e8] sm:$0xff]  ;;  %v1136_v53 = vld [vmem:[#allocation5 + $0x160] sm:$0xff] }
  0x1f   :  { %602 = vmatpush.bf16.msra.mxu0 %v1095_v16  ;;  %v1144_v54 = vld [vmem:[#allocation5 + $0x1a0] sm:$0xff]  ;;  %v1127_v56 = vld [vmem:[#allocation5 + $0x118] sm:$0xff]  ;;  %v1126_v60 = vld [vmem:[#allocation5 + $0x110] sm:$0xff] }
  0x20   :  { %615 = vmatpush.bf16.msra.mxu1 %v1103_v17  ;;  %v1152_v55 = vld [vmem:[#allocation5 + $0x1e0] sm:$0xff]  ;;  %v1135_v57 = vld [vmem:[#allocation5 + $0x158] sm:$0xff]  ;;  %v1134_v61 = vld [vmem:[#allocation5 + $0x150] sm:$0xff] }
  0x21   :  { %628 = vmatpush.bf16.msra.mxu2 %v1111_v18  ;;  %v1143_v58 = vld [vmem:[#allocation5 + $0x198] sm:$0xff]  ;;  %v1142_v62 = vld [vmem:[#allocation5 + $0x190] sm:$0xff]  ;;  %v1125_v0 = vld [vmem:[#allocation5 + $0x108] sm:$0xff] }
  0x22   :  { %641 = vmatpush.bf16.msra.mxu3 %v1119_v19  ;;  %v1151_v59 = vld [vmem:[#allocation5 + $0x1d8] sm:$0xff]  ;;  %v1150_v63 = vld [vmem:[#allocation5 + $0x1d0] sm:$0xff]  ;;  %v1133_v1 = vld [vmem:[#allocation5 + $0x148] sm:$0xff] }
  0x23   :  { %603 = vmatpush.bf16.msra.mxu0 %v1094_v20  ;;  %v1141_v2 = vld [vmem:[#allocation5 + $0x188] sm:$0xff]  ;;  %v1124_v4 = vld [vmem:[#allocation5 + $0x100] sm:$0xff]  ;;  %v72_v10 = vld [vmem:[#allocation2 + $0x30] sm:$0xff] }
  0x24   :  { %616 = vmatpush.bf16.msra.mxu1 %v1102_v21  ;;  %v1149_v3 = vld [vmem:[#allocation5 + $0x1c8] sm:$0xff]  ;;  %v1132_v5 = vld [vmem:[#allocation5 + $0x140] sm:$0xff]  ;;  %v73_v11 = vld [vmem:[#allocation2 + $0x38] sm:$0xff]  ;;  %v80_v14 = vpack.c.bf16 %v72_v10, %v72_v10 }
  0x25   :  { %629 = vmatpush.bf16.msra.mxu2 %v1110_v22  ;;  %v1140_v6 = vld [vmem:[#allocation5 + $0x180] sm:$0xff]  ;;  %v71_v8 = vld [vmem:[#allocation2 + $0x28] sm:$0xff]  ;;  %v81_v15 = vpack.c.bf16 %v73_v11, %v73_v11  ;;  %v1163_v16 = vld [vmem:[#allocation7 + $0x38] sm:$0xff] }
  0x26   :  { %642 = vmatpush.bf16.msra.mxu3 %v1118_v23  ;;  %v70_v7 = vld [vmem:[#allocation2 + $0x20] sm:$0xff]  ;;  %v79_v13 = vpack.c.bf16 %v71_v8, %v71_v8  ;;  %v1162_v17 = vld [vmem:[#allocation7 + $0x30] sm:$0xff]  ;;  %v1161_v18 = vld [vmem:[#allocation7 + $0x28] sm:$0xff] }
  0x27   :  { %604 = vmatpush.bf16.msra.mxu0 %v1093_v24  ;;  %v1148_v9 = vld [vmem:[#allocation5 + $0x1c0] sm:$0xff]  ;;  %v78_v12 = vpack.c.bf16 %v70_v7, %v70_v7  ;;  %v1159_v20 = vld [vmem:[#allocation7 + $0x18] sm:$0xff]  ;;  %v1158_v22 = vld [vmem:[#allocation7 + $0x10] sm:$0xff] }
  0x28   :  { %617 = vmatpush.bf16.msra.mxu1 %v1101_v25  ;;  %v1160_v19 = vld [vmem:[#allocation7 + $0x20] sm:$0xff]  ;;  %v1157_v24 = vld [vmem:[#allocation7 + $0x8] sm:$0xff] }
  0x29   :  { %630 = vmatpush.bf16.msra.mxu2 %v1109_v26 }
  0x2a   :  { %643 = vmatpush.bf16.msra.mxu3 %v1117_v27 }
  0x2b   :  { %605 = vmatpush.bf16.msra.mxu0 %v1092_v28  ;;  %v1156_v28 = vld [vmem:[#allocation7] sm:$0xff] }
  0x2c   :  { %618 = vmatpush.bf16.msra.mxu1 %v1100_v29 }
  0x2d   :  { %631 = vmatpush.bf16.msra.mxu2 %v1108_v30  ;;  %v1170_v30 = vld [vmem:[%s1330_s2] ss:$0 sm:$0xff] }
  0x2e   :  { %644 = vmatpush.bf16.msra.mxu3 %v1116_v31  ;;  %606 = vmatmul.bf16.vlgmr.msra.gmra.mxu0 %v74_v41 }
  0x2f   :  { %650 = vmatpush.bf16.msrb.mxu0 %v1131_v32  ;;  %619 = vmatmul.bf16.vlgmr.msra.gmra.mxu1 %v75_v43 }
  0x30   :  { %663 = vmatpush.bf16.msrb.mxu1 %v1139_v35  ;;  %632 = vmatmul.bf16.vlgmr.msra.gmra.mxu2 %v76_v40 }
  0x31   :  { %676 = vmatpush.bf16.msrb.mxu2 %v1147_v38  ;;  %645 = vmatmul.bf16.vlgmr.msra.gmra.mxu3 %v77_v42 }
  0x32   :  { %689 = vmatpush.bf16.msrb.mxu3 %v1155_v39 }
  0x33   :  { %651 = vmatpush.bf16.msrb.mxu0 %v1130_v44 }
  0x34   :  { %664 = vmatpush.bf16.msrb.mxu1 %v1138_v45 }
  0x35   :  { %677 = vmatpush.bf16.msrb.mxu2 %v1146_v46 }
  0x36   :  { %690 = vmatpush.bf16.msrb.mxu3 %v1154_v47 }
  0x37   :  { %652 = vmatpush.bf16.msrb.mxu0 %v1129_v48 }
  0x38   :  { %665 = vmatpush.bf16.msrb.mxu1 %v1137_v49 }
  0x39   :  { %678 = vmatpush.bf16.msrb.mxu2 %v1145_v50 }
  0x3a   :  { %691 = vmatpush.bf16.msrb.mxu3 %v1153_v51  ;;  %v1171_v51 = vld [vmem:[%s1332_s4] ss:$0 sm:$0xff] }
  0x3b   :  { %653 = vmatpush.bf16.msrb.mxu0 %v1128_v52 }
  0x3c   :  { %666 = vmatpush.bf16.msrb.mxu1 %v1136_v53 }
  0x3d   :  { %679 = vmatpush.bf16.msrb.mxu2 %v1144_v54 }
  0x3e   :  { %692 = vmatpush.bf16.msrb.mxu3 %v1152_v55 }
  0x3f   :  { %654 = vmatpush.bf16.msrb.mxu0 %v1127_v56 }
  0x40   :  { %667 = vmatpush.bf16.msrb.mxu1 %v1135_v57 }
  0x41   :  { %680 = vmatpush.bf16.msrb.mxu2 %v1143_v58 }
  0x42   :  { %693 = vmatpush.bf16.msrb.mxu3 %v1151_v59 }
  0x43   :  { %655 = vmatpush.bf16.msrb.mxu0 %v1126_v60 }
  0x44   :  { %668 = vmatpush.bf16.msrb.mxu1 %v1134_v61 }
  0x45   :  { %681 = vmatpush.bf16.msrb.mxu2 %v1142_v62 }
  0x46   :  { %694 = vmatpush.bf16.msrb.mxu3 %v1150_v63 }
  0x47   :  { %656 = vmatpush.bf16.msrb.mxu0 %v1125_v0 }
  0x48   :  { %669 = vmatpush.bf16.msrb.mxu1 %v1133_v1 }
  0x49   :  { %682 = vmatpush.bf16.msrb.mxu2 %v1141_v2 }
  0x4a   :  { %695 = vmatpush.bf16.msrb.mxu3 %v1149_v3 }
  0x4b   :  { %657 = vmatpush.bf16.msrb.mxu0 %v1124_v4 }
  0x4c   :  { %670 = vmatpush.bf16.msrb.mxu1 %v1132_v5 }
  0x4d   :  { %683 = vmatpush.bf16.msrb.mxu2 %v1140_v6 }
  0x4e   :  { %696 = vmatpush.bf16.msrb.mxu3 %v1148_v9  ;;  %658 = vmatmul.bf16.vlgmr.msrb.gmra.mxu0 %v78_v12 }
  0x4f   :  { %671 = vmatmul.bf16.vlgmr.msrb.gmra.mxu1 %v79_v13  ;;  %772 = vmatpush.bf16.msra.mxu0 %v1163_v16 }
  0x50   :  { %684 = vmatmul.bf16.vlgmr.msrb.gmra.mxu2 %v80_v14 }
  0x51   :  { %697 = vmatmul.bf16.vlgmr.msrb.gmra.mxu3 %v81_v15 }
  0x53   :  { %773 = vmatpush.bf16.msra.mxu0 %v1162_v17 }
  0x57   :  { %774 = vmatpush.bf16.msra.mxu0 %v1161_v18 }
  0x5b   :  { %775 = vmatpush.bf16.msra.mxu0 %v1160_v19 }
  0x5f   :  { %776 = vmatpush.bf16.msra.mxu0 %v1159_v20 }
  0x63   :  { %777 = vmatpush.bf16.msra.mxu0 %v1158_v22 }
  0x67   :  { %778 = vmatpush.bf16.msra.mxu0 %v1157_v24 }
  0x6b   :  { %779 = vmatpush.bf16.msra.mxu0 %v1156_v28 }
  0xab   :  { %v607_v21 = vpop.f32.mrf.mxu0 }
  0xac   :  { %v620_v23 = vpop.f32.mrf.mxu1  ;;  %v608_v33 = vadd.f32 %v1170_v30, %v607_v21 }
  0xae   :  { %v621_v34 = vadd.f32 %v620_v23, %v608_v33 }
  0xb3   :  { %v633_v25 = vpop.f32.mrf.mxu2  ;;  %v609_v27 = vpop.f32.mrf.mxu0 }
  0xb4   :  { %v646_v26 = vpop.f32.mrf.mxu3  ;;  %v622_v29 = vpop.f32.mrf.mxu1  ;;  %v634_v35 = vadd.f32 %v633_v25, %v621_v34 }
  0xb6   :  { %v647_v36 = vadd.f32 %v646_v26, %v634_v35 }
  0xbb   :  { %v635_v31 = vpop.f32.mrf.mxu2 }
  0xbc   :  { %v648_v32 = vpop.f32.mrf.mxu3 }
  0xcb   :  { %v659_v37 = vpop.f32.mrf.mxu0 }
  0xcc   :  { %v672_v38 = vpop.f32.mrf.mxu1  ;;  %v660_v39 = vadd.f32 %v659_v37, %v647_v36 }
  0xce   :  { %v673_v40 = vadd.f32 %v672_v38, %v660_v39 }
  0xd3   :  { %v685_v41 = vpop.f32.mrf.mxu2  ;;  %v661_v44 = vpop.f32.mrf.mxu0 }
  0xd4   :  { %v698_v42 = vpop.f32.mrf.mxu3  ;;  %v686_v43 = vadd.f32 %v685_v41, %v673_v40  ;;  %v674_v45 = vpop.f32.mrf.mxu1 }
  0xd6   :  { %v699_v46 = vadd.f32 %v698_v42, %v686_v43 }
  0xd8   :  { %v702_v47 = vmax.f32 %v699_v46, 0.0 }
  0xda   :  { %v703_v48 = vpack.c.bf16 %v702_v47, %v702_v47 }
  0xdb   :  { %v687_v49 = vpop.f32.mrf.mxu2 }
  0xdc   :  { %v700_v50 = vpop.f32.mrf.mxu3  ;;  %780 = vmatmul.bf16.vlgmr.msra.gmra.mxu0 %v703_v48 }
 0x159   :  { %v781_v52 = vpop.f32.mrf.mxu0 }
 0x15a   :  { %v782_v53 = vadd.f32 %v1171_v51, %v781_v52 }
 0x15c   :  { %785 = vst [vmem:[#allocation8] sm:$0xff] %v782_v53 }
 0x15d   :  { %796 = dma.vmem_to_hbm [thread:$0]  %s792_s11, 128, %s794_s14, [#allocation4]  }
 0x161   :  { %v783_v54 = vpop.f32.mrf.mxu0 }
 0x162   :  { %1272 = dma.done.wait [#allocation4], 128  }
 0x163   :  { %1273 = vsyncadd [#allocation4], 4294967168 }
 0x164   :  { %801 = vsyncpa [#allocation3], 1 }
 0x165   :  { %802 = vsyncpa [#allocation6], 1 }
 0x166   :  { %803 = vsyncpa [#allocation4], 1 }

// kernel: tpu_custom_call.1
= control target key start
LH: loop header
LB: loop body
LE: loop exit
PB: predicated region body
PF: predicated region fallthrough
CT: control target
= control target key end

     0   :  { %10 = vsyncpa [#allocation3], 0  ;;  %s1328_s0 = inlined_call_operand.hbm [shape: f32[8,1024], index: 0, kind: input, shape index: {}]   ;;  %s1329_s1 = inlined_call_operand.hbm [shape: bf16[1024,128], index: 1, kind: input, shape index: {}]   ;;  %s1330_s2 = inlined_call_operand.vmem [shape: f32[1,128], index: 2, kind: input, shape index: {}]   ;;  %s1331_s3 = inlined_call_operand.hbm [shape: bf16[128,128], index: 3, kind: input, shape index: {}]   ;;  %s1332_s4 = inlined_call_operand.vmem [shape: f32[1,128], index: 4, kind: input, shape index: {}]   ;;  %s1333_s5 = inlined_call_operand.hbm [shape: f32[8,128], index: 5, kind: output, shape index: {}]  }
   0x1   :  { %11 = vsyncpa [#allocation6], 0  ;;  %s28_s20 = sshll.u32 %s1329_s1, 4  ;;  %s29_s20 = int_to_ptr.hbm [resolvable:$true] %s28_s20 }
   0x2   :  { %12 = vsyncpa [#allocation4], 0  ;;  %s1274_s21 = smov [#allocation5]   ;;  %s18_s25 = sshll.u32 %s1328_s0, 4  ;;  %s19_s25 = int_to_ptr.hbm [resolvable:$true] %s18_s25 }
   0x3   :  { %s30_s22 = sshll.u32 %s1274_s21, 4  ;;  %s1275_s26 = smov 64   ;;  %s31_s22 = int_to_ptr.vmem [resolvable:$true] %s30_s22 }
   0x4   :  { %s1276_s27 = smov 4   ;;  %s1277_s28 = smov [#allocation2]  }
   0x5   :  { %36 = dma.hbm_to_vmem [thread:$0]  %s29_s20, 8192, %s31_s22, [#allocation6], %s1275_s26, %s1275_s26, %s1276_s27  }
   0x6   :  { %s20_s29 = sshll.u32 %s1277_s28, 4  ;;  %s43_s7 = sshll.u32 %s1331_s3, 4  ;;  %s21_s29 = int_to_ptr.vmem [resolvable:$true] %s20_s29  ;;  %s44_s7 = int_to_ptr.hbm [resolvable:$true] %s43_s7 }
   0x7   :  { %23 = dma.hbm_to_vmem [thread:$0]  %s19_s25, 1024, %s21_s29, [#allocation3]  }
   0x8   :  { %s1278_s1 = smov [#allocation7]  }
   0x9   :  { %s45_s8 = sshll.u32 %s1278_s1, 4  ;;  %s46_s8 = int_to_ptr.vmem [resolvable:$true] %s45_s8 }
   0xa   :  { %51 = dma.hbm_to_vmem [thread:$0]  %s44_s7, 1024, %s46_s8, [#allocation6], %s1275_s26, %s1275_s26, %s1276_s27  }
   0xb   :  { %1268 = dma.done.wait [#allocation3], 1024  }
   0xc   :  { %1269 = vsyncadd [#allocation3], 4294966272 }
   0xd   :  { %1270 = dma.done.wait [#allocation6], 9216  }
   0xe   :  { %1271 = vsyncadd [#allocation6], 4294958080  ;;  %v1099_v0 = vld [vmem:[#allocation5 + $0x38] sm:$0xff]  ;;  %v1098_v4 = vld [vmem:[#allocation5 + $0x30] sm:$0xff]  ;;  %s1279_s10 = smov [#allocation8]   ;;  %s793_s14 = sshll.u32 %s1333_s5, 4  ;;  %s794_s14 = int_to_ptr.hbm [resolvable:$true] %s793_s14 }
   0xf   :  { %v1107_v1 = vld [vmem:[#allocation5 + $0x78] sm:$0xff]  ;;  %598 = vmatpush.bf16.msra.mxu0 %v1099_v0  ;;  %v1106_v5 = vld [vmem:[#allocation5 + $0x70] sm:$0xff]  ;;  %v1097_v8 = vld [vmem:[#allocation5 + $0x28] sm:$0xff]  ;;  %s791_s11 = sshll.u32 %s1279_s10, 4  ;;  %s792_s11 = int_to_ptr.vmem [resolvable:$true] %s791_s11 }
  0x10   :  { %v1115_v2 = vld [vmem:[#allocation5 + $0xb8] sm:$0xff]  ;;  %611 = vmatpush.bf16.msra.mxu1 %v1107_v1  ;;  %v1114_v6 = vld [vmem:[#allocation5 + $0xb0] sm:$0xff]  ;;  %v1105_v9 = vld [vmem:[#allocation5 + $0x68] sm:$0xff] }
  0x11   :  { %v1123_v3 = vld [vmem:[#allocation5 + $0xf8] sm:$0xff]  ;;  %624 = vmatpush.bf16.msra.mxu2 %v1115_v2  ;;  %v1122_v7 = vld [vmem:[#allocation5 + $0xf0] sm:$0xff]  ;;  %v1113_v10 = vld [vmem:[#allocation5 + $0xa8] sm:$0xff] }
  0x12   :  { %637 = vmatpush.bf16.msra.mxu3 %v1123_v3  ;;  %v1121_v11 = vld [vmem:[#allocation5 + $0xe8] sm:$0xff]  ;;  %v1096_v12 = vld [vmem:[#allocation5 + $0x20] sm:$0xff]  ;;  %v1095_v16 = vld [vmem:[#allocation5 + $0x18] sm:$0xff] }
  0x13   :  { %599 = vmatpush.bf16.msra.mxu0 %v1098_v4  ;;  %v1104_v13 = vld [vmem:[#allocation5 + $0x60] sm:$0xff]  ;;  %v1103_v17 = vld [vmem:[#allocation5 + $0x58] sm:$0xff]  ;;  %v1094_v20 = vld [vmem:[#allocation5 + $0x10] sm:$0xff] }
  0x14   :  { %612 = vmatpush.bf16.msra.mxu1 %v1106_v5  ;;  %v1112_v14 = vld [vmem:[#allocation5 + $0xa0] sm:$0xff]  ;;  %v1111_v18 = vld [vmem:[#allocation5 + $0x98] sm:$0xff]  ;;  %v1102_v21 = vld [vmem:[#allocation5 + $0x50] sm:$0xff] }
  0x15   :  { %625 = vmatpush.bf16.msra.mxu2 %v1114_v6  ;;  %v1120_v15 = vld [vmem:[#allocation5 + $0xe0] sm:$0xff]  ;;  %v1119_v19 = vld [vmem:[#allocation5 + $0xd8] sm:$0xff]  ;;  %v1110_v22 = vld [vmem:[#allocation5 + $0x90] sm:$0xff] }
  0x16   :  { %638 = vmatpush.bf16.msra.mxu3 %v1122_v7  ;;  %v1118_v23 = vld [vmem:[#allocation5 + $0xd0] sm:$0xff]  ;;  %v1093_v24 = vld [vmem:[#allocation5 + $0x8] sm:$0xff]  ;;  %v1092_v28 = vld [vmem:[#allocation5] sm:$0xff] }
  0x17   :  { %600 = vmatpush.bf16.msra.mxu0 %v1097_v8  ;;  %v1101_v25 = vld [vmem:[#allocation5 + $0x48] sm:$0xff]  ;;  %v1100_v29 = vld [vmem:[#allocation5 + $0x40] sm:$0xff]  ;;  %v1131_v32 = vld [vmem:[#allocation5 + $0x138] sm:$0xff] }
  0x18   :  { %613 = vmatpush.bf16.msra.mxu1 %v1105_v9  ;;  %v1109_v26 = vld [vmem:[#allocation5 + $0x88] sm:$0xff]  ;;  %v1108_v30 = vld [vmem:[#allocation5 + $0x80] sm:$0xff]  ;;  %v68_v33 = vld [vmem:[#allocation2 + $0x10] sm:$0xff] }
  0x19   :  { %626 = vmatpush.bf16.msra.mxu2 %v1113_v10  ;;  %v1117_v27 = vld [vmem:[#allocation5 + $0xc8] sm:$0xff]  ;;  %v1116_v31 = vld [vmem:[#allocation5 + $0xc0] sm:$0xff]  ;;  %v1139_v35 = vld [vmem:[#allocation5 + $0x178] sm:$0xff]  ;;  %v76_v40 = vpack.c.bf16 %v68_v33, %v68_v33 }
  0x1a   :  { %639 = vmatpush.bf16.msra.mxu3 %v1121_v11  ;;  %v66_v34 = vld [vmem:[#allocation2] sm:$0xff]  ;;  %v69_v36 = vld [vmem:[#allocation2 + $0x18] sm:$0xff]  ;;  %v67_v37 = vld [vmem:[#allocation2 + $0x8] sm:$0xff] }
  0x1b   :  { %601 = vmatpush.bf16.msra.mxu0 %v1096_v12  ;;  %v1147_v38 = vld [vmem:[#allocation5 + $0x1b8] sm:$0xff]  ;;  %v74_v41 = vpack.c.bf16 %v66_v34, %v66_v34  ;;  %v77_v42 = vpack.c.bf16 %v69_v36, %v69_v36  ;;  %v75_v43 = vpack.c.bf16 %v67_v37, %v67_v37  ;;  %v1130_v44 = vld [vmem:[#allocation5 + $0x130] sm:$0xff]  ;;  %v1129_v48 = vld [vmem:[#allocation5 + $0x128] sm:$0xff] }
  0x1c   :  { %614 = vmatpush.bf16.msra.mxu1 %v1104_v13  ;;  %v1155_v39 = vld [vmem:[#allocation5 + $0x1f8] sm:$0xff]  ;;  %v1138_v45 = vld [vmem:[#allocation5 + $0x170] sm:$0xff]  ;;  %v1137_v49 = vld [vmem:[#allocation5 + $0x168] sm:$0xff] }
  0x1d   :  { %627 = vmatpush.bf16.msra.mxu2 %v1112_v14  ;;  %v1146_v46 = vld [vmem:[#allocation5 + $0x1b0] sm:$0xff]  ;;  %v1145_v50 = vld [vmem:[#allocation5 + $0x1a8] sm:$0xff]  ;;  %v1128_v52 = vld [vmem:[#allocation5 + $0x120] sm:$0xff] }
  0x1e   :  { %640 = vmatpush.bf16.msra.mxu3 %v1120_v15  ;;  %v1154_v47 = vld [vmem:[#allocation5 + $0x1f0] sm:$0xff]  ;;  %v1153_v51 = vld [vmem:[#allocation5 + $0x1e8] sm:$0xff]  ;;  %v1136_v53 = vld [vmem:[#allocation5 + $0x160] sm:$0xff] }
  0x1f   :  { %602 = vmatpush.bf16.msra.mxu0 %v1095_v16  ;;  %v1144_v54 = vld [vmem:[#allocation5 + $0x1a0] sm:$0xff]  ;;  %v1127_v56 = vld [vmem:[#allocation5 + $0x118] sm:$0xff]  ;;  %v1126_v60 = vld [vmem:[#allocation5 + $0x110] sm:$0xff] }
  0x20   :  { %615 = vmatpush.bf16.msra.mxu1 %v1103_v17  ;;  %v1152_v55 = vld [vmem:[#allocation5 + $0x1e0] sm:$0xff]  ;;  %v1135_v57 = vld [vmem:[#allocation5 + $0x158] sm:$0xff]  ;;  %v1134_v61 = vld [vmem:[#allocation5 + $0x150] sm:$0xff] }
  0x21   :  { %628 = vmatpush.bf16.msra.mxu2 %v1111_v18  ;;  %v1143_v58 = vld [vmem:[#allocation5 + $0x198] sm:$0xff]  ;;  %v1142_v62 = vld [vmem:[#allocation5 + $0x190] sm:$0xff]  ;;  %v1125_v0 = vld [vmem:[#allocation5 + $0x108] sm:$0xff] }
  0x22   :  { %641 = vmatpush.bf16.msra.mxu3 %v1119_v19  ;;  %v1151_v59 = vld [vmem:[#allocation5 + $0x1d8] sm:$0xff]  ;;  %v1150_v63 = vld [vmem:[#allocation5 + $0x1d0] sm:$0xff]  ;;  %v1133_v1 = vld [vmem:[#allocation5 + $0x148] sm:$0xff] }
  0x23   :  { %603 = vmatpush.bf16.msra.mxu0 %v1094_v20  ;;  %v1141_v2 = vld [vmem:[#allocation5 + $0x188] sm:$0xff]  ;;  %v1124_v4 = vld [vmem:[#allocation5 + $0x100] sm:$0xff]  ;;  %v72_v10 = vld [vmem:[#allocation2 + $0x30] sm:$0xff] }
  0x24   :  { %616 = vmatpush.bf16.msra.mxu1 %v1102_v21  ;;  %v1149_v3 = vld [vmem:[#allocation5 + $0x1c8] sm:$0xff]  ;;  %v1132_v5 = vld [vmem:[#allocation5 + $0x140] sm:$0xff]  ;;  %v73_v11 = vld [vmem:[#allocation2 + $0x38] sm:$0xff]  ;;  %v80_v14 = vpack.c.bf16 %v72_v10, %v72_v10 }
  0x25   :  { %629 = vmatpush.bf16.msra.mxu2 %v1110_v22  ;;  %v1140_v6 = vld [vmem:[#allocation5 + $0x180] sm:$0xff]  ;;  %v71_v8 = vld [vmem:[#allocation2 + $0x28] sm:$0xff]  ;;  %v81_v15 = vpack.c.bf16 %v73_v11, %v73_v11  ;;  %v1163_v16 = vld [vmem:[#allocation7 + $0x38] sm:$0xff] }
  0x26   :  { %642 = vmatpush.bf16.msra.mxu3 %v1118_v23  ;;  %v70_v7 = vld [vmem:[#allocation2 + $0x20] sm:$0xff]  ;;  %v79_v13 = vpack.c.bf16 %v71_v8, %v71_v8  ;;  %v1162_v17 = vld [vmem:[#allocation7 + $0x30] sm:$0xff]  ;;  %v1161_v18 = vld [vmem:[#allocation7 + $0x28] sm:$0xff] }
  0x27   :  { %604 = vmatpush.bf16.msra.mxu0 %v1093_v24  ;;  %v1148_v9 = vld [vmem:[#allocation5 + $0x1c0] sm:$0xff]  ;;  %v78_v12 = vpack.c.bf16 %v70_v7, %v70_v7  ;;  %v1159_v20 = vld [vmem:[#allocation7 + $0x18] sm:$0xff]  ;;  %v1158_v22 = vld [vmem:[#allocation7 + $0x10] sm:$0xff] }
  0x28   :  { %617 = vmatpush.bf16.msra.mxu1 %v1101_v25  ;;  %v1160_v19 = vld [vmem:[#allocation7 + $0x20] sm:$0xff]  ;;  %v1157_v24 = vld [vmem:[#allocation7 + $0x8] sm:$0xff] }
  0x29   :  { %630 = vmatpush.bf16.msra.mxu2 %v1109_v26 }
  0x2a   :  { %643 = vmatpush.bf16.msra.mxu3 %v1117_v27 }
  0x2b   :  { %605 = vmatpush.bf16.msra.mxu0 %v1092_v28  ;;  %v1156_v28 = vld [vmem:[#allocation7] sm:$0xff] }
  0x2c   :  { %618 = vmatpush.bf16.msra.mxu1 %v1100_v29 }
  0x2d   :  { %631 = vmatpush.bf16.msra.mxu2 %v1108_v30  ;;  %v1170_v30 = vld [vmem:[%s1330_s2] ss:$0 sm:$0xff] }
  0x2e   :  { %644 = vmatpush.bf16.msra.mxu3 %v1116_v31  ;;  %606 = vmatmul.bf16.vlgmr.msra.gmra.mxu0 %v74_v41 }
  0x2f   :  { %650 = vmatpush.bf16.msrb.mxu0 %v1131_v32  ;;  %619 = vmatmul.bf16.vlgmr.msra.gmra.mxu1 %v75_v43 }
  0x30   :  { %663 = vmatpush.bf16.msrb.mxu1 %v1139_v35  ;;  %632 = vmatmul.bf16.vlgmr.msra.gmra.mxu2 %v76_v40 }
  0x31   :  { %676 = vmatpush.bf16.msrb.mxu2 %v1147_v38  ;;  %645 = vmatmul.bf16.vlgmr.msra.gmra.mxu3 %v77_v42 }
  0x32   :  { %689 = vmatpush.bf16.msrb.mxu3 %v1155_v39 }
  0x33   :  { %651 = vmatpush.bf16.msrb.mxu0 %v1130_v44 }
  0x34   :  { %664 = vmatpush.bf16.msrb.mxu1 %v1138_v45 }
  0x35   :  { %677 = vmatpush.bf16.msrb.mxu2 %v1146_v46 }
  0x36   :  { %690 = vmatpush.bf16.msrb.mxu3 %v1154_v47 }
  0x37   :  { %652 = vmatpush.bf16.msrb.mxu0 %v1129_v48 }
  0x38   :  { %665 = vmatpush.bf16.msrb.mxu1 %v1137_v49 }
  0x39   :  { %678 = vmatpush.bf16.msrb.mxu2 %v1145_v50 }
  0x3a   :  { %691 = vmatpush.bf16.msrb.mxu3 %v1153_v51  ;;  %v1171_v51 = vld [vmem:[%s1332_s4] ss:$0 sm:$0xff] }
  0x3b   :  { %653 = vmatpush.bf16.msrb.mxu0 %v1128_v52 }
  0x3c   :  { %666 = vmatpush.bf16.msrb.mxu1 %v1136_v53 }
  0x3d   :  { %679 = vmatpush.bf16.msrb.mxu2 %v1144_v54 }
  0x3e   :  { %692 = vmatpush.bf16.msrb.mxu3 %v1152_v55 }
  0x3f   :  { %654 = vmatpush.bf16.msrb.mxu0 %v1127_v56 }
  0x40   :  { %667 = vmatpush.bf16.msrb.mxu1 %v1135_v57 }
  0x41   :  { %680 = vmatpush.bf16.msrb.mxu2 %v1143_v58 }
  0x42   :  { %693 = vmatpush.bf16.msrb.mxu3 %v1151_v59 }
  0x43   :  { %655 = vmatpush.bf16.msrb.mxu0 %v1126_v60 }
  0x44   :  { %668 = vmatpush.bf16.msrb.mxu1 %v1134_v61 }
  0x45   :  { %681 = vmatpush.bf16.msrb.mxu2 %v1142_v62 }
  0x46   :  { %694 = vmatpush.bf16.msrb.mxu3 %v1150_v63 }
  0x47   :  { %656 = vmatpush.bf16.msrb.mxu0 %v1125_v0 }
  0x48   :  { %669 = vmatpush.bf16.msrb.mxu1 %v1133_v1 }
  0x49   :  { %682 = vmatpush.bf16.msrb.mxu2 %v1141_v2 }
  0x4a   :  { %695 = vmatpush.bf16.msrb.mxu3 %v1149_v3 }
  0x4b   :  { %657 = vmatpush.bf16.msrb.mxu0 %v1124_v4 }
  0x4c   :  { %670 = vmatpush.bf16.msrb.mxu1 %v1132_v5 }
  0x4d   :  { %683 = vmatpush.bf16.msrb.mxu2 %v1140_v6 }
  0x4e   :  { %696 = vmatpush.bf16.msrb.mxu3 %v1148_v9  ;;  %658 = vmatmul.bf16.vlgmr.msrb.gmra.mxu0 %v78_v12 }
  0x4f   :  { %671 = vmatmul.bf16.vlgmr.msrb.gmra.mxu1 %v79_v13  ;;  %772 = vmatpush.bf16.msra.mxu0 %v1163_v16 }
  0x50   :  { %684 = vmatmul.bf16.vlgmr.msrb.gmra.mxu2 %v80_v14 }
  0x51   :  { %697 = vmatmul.bf16.vlgmr.msrb.gmra.mxu3 %v81_v15 }
  0x53   :  { %773 = vmatpush.bf16.msra.mxu0 %v1162_v17 }
  0x57   :  { %774 = vmatpush.bf16.msra.mxu0 %v1161_v18 }
  0x5b   :  { %775 = vmatpush.bf16.msra.mxu0 %v1160_v19 }
  0x5f   :  { %776 = vmatpush.bf16.msra.mxu0 %v1159_v20 }
  0x63   :  { %777 = vmatpush.bf16.msra.mxu0 %v1158_v22 }
  0x67   :  { %778 = vmatpush.bf16.msra.mxu0 %v1157_v24 }
  0x6b   :  { %779 = vmatpush.bf16.msra.mxu0 %v1156_v28 }
  0xab   :  { %v607_v21 = vpop.f32.mrf.mxu0 }
  0xac   :  { %v620_v23 = vpop.f32.mrf.mxu1  ;;  %v608_v33 = vadd.f32 %v1170_v30, %v607_v21 }
  0xae   :  { %v621_v34 = vadd.f32 %v620_v23, %v608_v33 }
  0xb3   :  { %v633_v25 = vpop.f32.mrf.mxu2  ;;  %v609_v27 = vpop.f32.mrf.mxu0 }
  0xb4   :  { %v646_v26 = vpop.f32.mrf.mxu3  ;;  %v622_v29 = vpop.f32.mrf.mxu1  ;;  %v634_v35 = vadd.f32 %v633_v25, %v621_v34 }
  0xb6   :  { %v647_v36 = vadd.f32 %v646_v26, %v634_v35 }
  0xbb   :  { %v635_v31 = vpop.f32.mrf.mxu2 }
  0xbc   :  { %v648_v32 = vpop.f32.mrf.mxu3 }
  0xcb   :  { %v659_v37 = vpop.f32.mrf.mxu0 }
  0xcc   :  { %v672_v38 = vpop.f32.mrf.mxu1  ;;  %v660_v39 = vadd.f32 %v659_v37, %v647_v36 }
  0xce   :  { %v673_v40 = vadd.f32 %v672_v38, %v660_v39 }
  0xd3   :  { %v685_v41 = vpop.f32.mrf.mxu2  ;;  %v661_v44 = vpop.f32.mrf.mxu0 }
  0xd4   :  { %v698_v42 = vpop.f32.mrf.mxu3  ;;  %v686_v43 = vadd.f32 %v685_v41, %v673_v40  ;;  %v674_v45 = vpop.f32.mrf.mxu1 }
  0xd6   :  { %v699_v46 = vadd.f32 %v698_v42, %v686_v43 }
  0xd8   :  { %v702_v47 = vmax.f32 %v699_v46, 0.0 }
  0xda   :  { %v703_v48 = vpack.c.bf16 %v702_v47, %v702_v47 }
  0xdb   :  { %v687_v49 = vpop.f32.mrf.mxu2 }
  0xdc   :  { %v700_v50 = vpop.f32.mrf.mxu3  ;;  %780 = vmatmul.bf16.vlgmr.msra.gmra.mxu0 %v703_v48 }
 0x159   :  { %v781_v52 = vpop.f32.mrf.mxu0 }
 0x15a   :  { %v782_v53 = vadd.f32 %v1171_v51, %v781_v52 }
 0x15c   :  { %785 = vst [vmem:[#allocation8] sm:$0xff] %v782_v53 }
 0x15d   :  { %796 = dma.vmem_to_hbm [thread:$0]  %s792_s11, 128, %s794_s14, [#allocation4]  }
 0x161   :  { %v783_v54 = vpop.f32.mrf.mxu0 }
 0x162   :  { %1272 = dma.done.wait [#allocation4], 128  }
 0x163   :  { %1273 = vsyncadd [#allocation4], 4294967168 }
 0x164   :  { %801 = vsyncpa [#allocation3], 1 }
 0x165   :  { %802 = vsyncpa [#allocation6], 1 }
 0x166   :  { %803 = vsyncpa [#allocation4], 1 }

</bundles_post_ra>
